<compile_context>
chip_gen: v5e
topology: v5e:2x2
jax: 0.10.0
libtpu: 0.0.40
codegen_flags: <defaults>
</compile_context>

<pallas_src>
import functools

import jax
import jax.numpy as jnp
import numpy as np
from jax.experimental import pallas as pl
from jax.experimental.pallas import tpu as pltpu

LANE = 128        # feature dims padded to a multiple of this (one MXU pass)
ROW_ALIGN = 16    # batch-tile row granularity (bf16 packs 16 rows / vreg)
TILE_M_MAX = 512  # rows per grid step at large batch


def _round_up(v, m):
    return ((v + m - 1) // m) * m


# -----------------------------------------------------------------------------
# Fused kernel body. refs = (x, a, w0x, w0a, b0, [w_i, b_i]*, w_last_row,
# b_last, out). All params VMEM-resident; activations stay on-chip.
# -----------------------------------------------------------------------------
def _fused_qmlp_kernel(*refs, num_hidden):
    x_ref, a_ref = refs[0], refs[1]
    w0x_ref, w0a_ref, b0_ref = refs[2], refs[3], refs[4]
    rest = refs[5:-1]
    out_ref = refs[-1]

    # Layer 0: split-K matmul (x and a fed separately -> no concat / K pad).
    # bf16 operands on the MXU, f32 accumulation.
    x_bf = x_ref[...].astype(jnp.bfloat16)
    a_bf = a_ref[...].astype(jnp.bfloat16)
    h = (jnp.dot(x_bf, w0x_ref[...], preferred_element_type=jnp.float32)
         + jnp.dot(a_bf, w0a_ref[...], preferred_element_type=jnp.float32)
         + b0_ref[...])
    h = jnp.tanh(h)                                        # f32 tanh (EUP)

    # Remaining hidden layers.
    for li in range(num_hidden - 1):
        w = rest[2 * li][...]                              # bf16 (Kp, Np)
        b = rest[2 * li + 1][...]                          # f32  (1, Np)
        h = jnp.tanh(jnp.dot(h.astype(jnp.bfloat16), w,
                             preferred_element_type=jnp.float32) + b)

    # Final layer has output width 1: VPU multiply + lane reduction instead of
    # a 128-column padded matmul, so only 4 B/row of Q is ever written back.
    w_last = rest[-2][...]                                 # f32 (1, Hp)
    b_last = rest[-1][...]                                 # f32 (1, 1)
    q = jnp.sum(h * w_last, axis=-1, keepdims=True) + b_last   # (tile_m, 1)
    out_ref[...] = q.astype(out_ref.dtype)


# -----------------------------------------------------------------------------
# Wrapper: one pallas_call with an M-tiled parallel grid; slice valid rows.
# -----------------------------------------------------------------------------
def _mlp_q_forward(x, a, kernel_params):
    batch, sf = x.shape
    ad = a.shape[1]
    num_hidden = (len(kernel_params) - 3) // 2

    tile_m = min(TILE_M_MAX, _round_up(batch, ROW_ALIGN))
    num_tiles = pl.cdiv(batch, tile_m)
    m_pad = num_tiles * tile_m

    in_specs = [
        pl.BlockSpec((tile_m, sf), lambda i: (i, 0)),      # x tile
        pl.BlockSpec((tile_m, ad), lambda i: (i, 0)),      # a tile
    ]
    # Weights / biases: full-array blocks with constant index_map -> stay
    # VMEM-resident across all grid iterations (no per-tile re-DMA).
    for p in kernel_params:
        in_specs.append(pl.BlockSpec(p.shape, lambda i: (0, 0)))

    out_spec = pl.BlockSpec((tile_m, 1), lambda i: (i, 0))

    # Cost estimate + VMEM sizing from the actual operands.
    param_bytes = int(sum(int(p.size) * p.dtype.itemsize for p in kernel_params))
    widths = [kernel_params[0].shape[1]] + [
        kernel_params[3 + 2 * i].shape[1] for i in range(num_hidden - 1)]
    flops = 2 * m_pad * (sf + ad) * widths[0]
    for kk, nn in zip(widths[:-1], widths[1:]):
        flops += 2 * m_pad * kk * nn
    flops += 2 * m_pad * widths[-1]
    transcendentals = m_pad * sum(widths)
    bytes_accessed = 4 * batch * (sf + ad) + param_bytes + 4 * m_pad

    io_tile_bytes = 4 * tile_m * (sf + ad + 1)
    act_bytes = 4 * tile_m * max(widths) * 3
    vmem_limit = int(min(60 * (1 << 20),
                         4 * (param_bytes + io_tile_bytes + act_bytes) + (4 << 20)))

    out = pl.pallas_call(
        functools.partial(_fused_qmlp_kernel, num_hidden=num_hidden),
        grid=(num_tiles,),
        out_shape=jax.ShapeDtypeStruct((m_pad, 1), jnp.float32),
        in_specs=in_specs,
        out_specs=out_spec,
        cost_estimate=pl.CostEstimate(flops=flops,
                                      transcendentals=transcendentals,
                                      bytes_accessed=bytes_accessed),
        compiler_params=pltpu.CompilerParams(
            dimension_semantics=("parallel",),   # v7x: tiles shard over 2 TCs
            vmem_limit_bytes=vmem_limit),
    )(x, a, *kernel_params)

    return out[:batch, 0]                        # == torch.squeeze(q, -1)


mlp_q_forward = jax.jit(_mlp_q_forward)


# -----------------------------------------------------------------------------
# Deterministic nn.Linear-style parameters, stored as (in, out) for matmul.
# -----------------------------------------------------------------------------
def init_q_params(key, state_features, action_dim, hidden_sizes, output_size=1):
    sizes = [state_features + action_dim] + list(hidden_sizes) + [output_size]
    keys = jax.random.split(key, len(sizes) - 1)
    params = []
    for i, k in enumerate(keys):
        bound = 1.0 / float(np.sqrt(sizes[i]))
        kw, kb = jax.random.split(k)
        w = jax.random.uniform(kw, (sizes[i], sizes[i + 1]), jnp.float32, -bound, bound)
        b = jax.random.uniform(kb, (sizes[i + 1],), jnp.float32, -bound, bound)
        params.append((w, b))
    return params


def prepare_kernel_params(params, state_features):
    """Split/pad/cast params into kernel operands.

    Layer 0 weight is split into its x-rows / a-rows (so x and a are fed
    without a wrapper-side concat); hidden weights are zero-padded to lane
    multiples and cast to bf16 (MXU-native); biases stay f32; the 1-wide final
    layer is stored as an f32 row for a VPU multiply + lane reduction.
    Padding is exact (zero weights + zero bias -> tanh(0)=0 downstream)."""
    num_hidden = len(params) - 1
    assert num_hidden >= 1

    w0, b0 = params[0]
    h0 = w0.shape[1]
    h0p = _round_up(h0, LANE)
    w0x = (jnp.zeros((state_features, h0p), jnp.float32)
           .at[:, :h0].set(w0[:state_features]).astype(jnp.bfloat16))
    w0a = (jnp.zeros((w0.shape[0] - state_features, h0p), jnp.float32)
           .at[:, :h0].set(w0[state_features:]).astype(jnp.bfloat16))
    b0p = jnp.zeros((1, h0p), jnp.float32).at[0, :h0].set(b0)
    flat = [w0x, w0a, b0p]

    for w, b in params[1:-1]:
        kin, kout = w.shape
        kp, np_ = _round_up(kin, LANE), _round_up(kout, LANE)
        wp = (jnp.zeros((kp, np_), jnp.float32)
              .at[:kin, :kout].set(w).astype(jnp.bfloat16))
        bp = jnp.zeros((1, np_), jnp.float32).at[0, :kout].set(b)
        flat += [wp, bp]

    w_last, b_last = params[-1]                      # (h_last, 1), (1,)
    hlp = _round_up(w_last.shape[0], LANE)
    w_last_row = (jnp.zeros((1, hlp), jnp.float32)
                  .at[0, :w_last.shape[0]].set(w_last[:, 0]))
    b_last_2d = jnp.reshape(b_last, (1, 1)).astype(jnp.float32)
    flat += [w_last_row, b_last_2d]
    return flat


if __name__ == "__main__":
    key = jax.random.PRNGKey(0)
    k_param, k_x, k_a = jax.random.split(key, 3)

    batch, state_features, action_dim = 2, 16, 4
    hidden_sizes = (32, 32)

    # TODO(synk): activation is fixed to tanh (the MLP default); an arbitrary
    # Python Callable activation cannot be passed through generically.
    params = init_q_params(k_param, state_features, action_dim, hidden_sizes)
    kernel_params = prepare_kernel_params(params, state_features)

    x = jax.random.normal(k_x, (batch, state_features), jnp.float32)
    a = jax.random.normal(k_a, (batch, action_dim), jnp.float32)

    q = jax.block_until_ready(mlp_q_forward(x, a, kernel_params))
    assert q.shape == (batch,), q.shape

    # Pure-JAX f32 reference (identical math to PyTorch MLPQFunction w/ tanh).
    h = jnp.concatenate([x, a], axis=-1)
    for w, b in params[:-1]:
        h = jnp.tanh(h @ w + b)
    ref = (h @ params[-1][0] + params[-1][1])[:, 0]
    # bf16 MXU weights with f32 accumulation -> loosened tolerance vs f32 ref.
    np.testing.assert_allclose(np.asarray(q), np.asarray(ref), rtol=2e-2, atol=2e-2)

    print("KERNEL_OK")
</pallas_src>

<mosaic_0001>
module attributes {stable_mosaic.version = 11 : i64} {
  func.func @_fused_qmlp_kernel(%arg0: i32, %arg1: memref<16x16xf32, #tpu.memory_space<vmem>>, %arg2: memref<16x4xf32, #tpu.memory_space<vmem>>, %arg3: memref<16x128xbf16, #tpu.memory_space<vmem>>, %arg4: memref<4x128xbf16, #tpu.memory_space<vmem>>, %arg5: memref<1x128xf32, #tpu.memory_space<vmem>>, %arg6: memref<128x128xbf16, #tpu.memory_space<vmem>>, %arg7: memref<1x128xf32, #tpu.memory_space<vmem>>, %arg8: memref<1x128xf32, #tpu.memory_space<vmem>>, %arg9: memref<1x1xf32, #tpu.memory_space<vmem>>, %arg10: memref<16x1xf32, #tpu.memory_space<vmem>>) attributes {dimension_semantics = [#tpu.dimension_semantics<parallel>], iteration_bounds = array<i64: 1>, scalar_prefetch = 0 : i64, scratch_operands = 0 : i64, tpu.core_type = #tpu.core_type<tc>, window_params = [{transform_indices = @transform_0, window_bounds = array<i64: 16, 16>}, {transform_indices = @transform_1, window_bounds = array<i64: 16, 4>}, {pipeline_mode = #tpu.pipeline_mode<synchronous>, transform_indices = @transform_2, window_bounds = array<i64: 16, 128>}, {pipeline_mode = #tpu.pipeline_mode<synchronous>, transform_indices = @transform_3, window_bounds = array<i64: 4, 128>}, {pipeline_mode = #tpu.pipeline_mode<synchronous>, transform_indices = @transform_4, window_bounds = array<i64: 1, 128>}, {pipeline_mode = #tpu.pipeline_mode<synchronous>, transform_indices = @transform_5, window_bounds = array<i64: 128, 128>}, {pipeline_mode = #tpu.pipeline_mode<synchronous>, transform_indices = @transform_6, window_bounds = array<i64: 1, 128>}, {pipeline_mode = #tpu.pipeline_mode<synchronous>, transform_indices = @transform_7, window_bounds = array<i64: 1, 128>}, {pipeline_mode = #tpu.pipeline_mode<synchronous>, transform_indices = @transform_8, window_bounds = array<i64: 1, 1>}, {transform_indices = @transform_9, window_bounds = array<i64: 16, 1>}]} {
    %c0 = arith.constant 0 : index
    %c0_0 = arith.constant 0 : index
    %0 = vector.load %arg1[%c0, %c0_0] : memref<16x16xf32, #tpu.memory_space<vmem>>, vector<16x16xf32>
    %1 = arith.truncf %0 : vector<16x16xf32> to vector<16x16xbf16>
    %c0_1 = arith.constant 0 : index
    %c0_2 = arith.constant 0 : index
    %2 = vector.load %arg2[%c0_1, %c0_2] : memref<16x4xf32, #tpu.memory_space<vmem>>, vector<16x4xf32>
    %3 = arith.truncf %2 : vector<16x4xf32> to vector<16x4xbf16>
    %c0_3 = arith.constant 0 : index
    %c0_4 = arith.constant 0 : index
    %4 = vector.load %arg3[%c0_3, %c0_4] : memref<16x128xbf16, #tpu.memory_space<vmem>>, vector<16x128xbf16>
    %cst = arith.constant dense<0.000000e+00> : vector<16x128xf32>
    %5 = tpu.matmul %1, %4, %cst {dimension_numbers = #tpu.dot_dimension_numbers<[1], [0], [0], [1], [0, 0, 1, 1], [], []>} : vector<16x16xbf16>, vector<16x128xbf16>, vector<16x128xf32> -> vector<16x128xf32>
    %c0_5 = arith.constant 0 : index
    %c0_6 = arith.constant 0 : index
    %6 = vector.load %arg4[%c0_5, %c0_6] : memref<4x128xbf16, #tpu.memory_space<vmem>>, vector<4x128xbf16>
    %cst_7 = arith.constant dense<0.000000e+00> : vector<16x128xf32>
    %7 = tpu.matmul %3, %6, %cst_7 {dimension_numbers = #tpu.dot_dimension_numbers<[1], [0], [0], [1], [0, 0, 1, 1], [], []>} : vector<16x4xbf16>, vector<4x128xbf16>, vector<16x128xf32> -> vector<16x128xf32>
    %8 = arith.addf %5, %7 : vector<16x128xf32>
    %c0_8 = arith.constant 0 : index
    %c0_9 = arith.constant 0 : index
    %9 = vector.load %arg5[%c0_8, %c0_9] : memref<1x128xf32, #tpu.memory_space<vmem>>, vector<1x128xf32>
    %10 = vector.broadcast %9 : vector<1x128xf32> to vector<16x128xf32>
    %11 = arith.addf %8, %10 : vector<16x128xf32>
    %12 = math.tanh %11 : vector<16x128xf32>
    %c0_10 = arith.constant 0 : index
    %c0_11 = arith.constant 0 : index
    %13 = vector.load %arg6[%c0_10, %c0_11] : memref<128x128xbf16, #tpu.memory_space<vmem>>, vector<128x128xbf16>
    %c0_12 = arith.constant 0 : index
    %c0_13 = arith.constant 0 : index
    %14 = vector.load %arg7[%c0_12, %c0_13] : memref<1x128xf32, #tpu.memory_space<vmem>>, vector<1x128xf32>
    %15 = arith.truncf %12 : vector<16x128xf32> to vector<16x128xbf16>
    %cst_14 = arith.constant dense<0.000000e+00> : vector<16x128xf32>
    %16 = tpu.matmul %15, %13, %cst_14 {dimension_numbers = #tpu.dot_dimension_numbers<[1], [0], [0], [1], [0, 0, 1, 1], [], []>} : vector<16x128xbf16>, vector<128x128xbf16>, vector<16x128xf32> -> vector<16x128xf32>
    %17 = vector.broadcast %14 : vector<1x128xf32> to vector<16x128xf32>
    %18 = arith.addf %16, %17 : vector<16x128xf32>
    %19 = math.tanh %18 : vector<16x128xf32>
    %c0_15 = arith.constant 0 : index
    %c0_16 = arith.constant 0 : index
    %20 = vector.load %arg8[%c0_15, %c0_16] : memref<1x128xf32, #tpu.memory_space<vmem>>, vector<1x128xf32>
    %c0_17 = arith.constant 0 : index
    %c0_18 = arith.constant 0 : index
    %21 = vector.load %arg9[%c0_17, %c0_18] : memref<1x1xf32, #tpu.memory_space<vmem>>, vector<1x1xf32>
    %22 = vector.broadcast %20 : vector<1x128xf32> to vector<16x128xf32>
    %23 = arith.mulf %19, %22 : vector<16x128xf32>
    %cst_19 = arith.constant dense<0.000000e+00> : vector<16xf32>
    %24 = vector.multi_reduction <add>, %23, %cst_19 [1] : vector<16x128xf32> to vector<16xf32>
    %25 = vector.shape_cast %24 : vector<16xf32> to vector<16x1xf32>
    %26 = vector.broadcast %21 : vector<1x1xf32> to vector<16x1xf32>
    %27 = arith.addf %25, %26 : vector<16x1xf32>
    %c0_20 = arith.constant 0 : index
    %c0_21 = arith.constant 0 : index
    %28 = vector.load %arg10[%c0_20, %c0_21] : memref<16x1xf32, #tpu.memory_space<vmem>>, vector<16x1xf32>
    tpu.vector_store %arg10[%c0_20, %c0_21], %27 {strides = array<i32>} : memref<16x1xf32, #tpu.memory_space<vmem>>, vector<16x1xf32>,
    return
  }
  func.func @transform_0(%arg0: i32) -> (i32, i32) {
    %c0_i32 = arith.constant 0 : i32
    %c0_i32_0 = arith.constant 0 : i32
    return %arg0, %c0_i32 : i32, i32
  }
  func.func @transform_1(%arg0: i32) -> (i32, i32) {
    %c0_i32 = arith.constant 0 : i32
    %c0_i32_0 = arith.constant 0 : i32
    return %arg0, %c0_i32 : i32, i32
  }
  func.func @transform_2(%arg0: i32) -> (i32, i32) {
    %c0_i32 = arith.constant 0 : i32
    %c0_i32_0 = arith.constant 0 : i32
    %c0_i32_1 = arith.constant 0 : i32
    return %c0_i32, %c0_i32_0 : i32, i32
  }
  func.func @transform_3(%arg0: i32) -> (i32, i32) {
    %c0_i32 = arith.constant 0 : i32
    %c0_i32_0 = arith.constant 0 : i32
    %c0_i32_1 = arith.constant 0 : i32
    return %c0_i32, %c0_i32_0 : i32, i32
  }
  func.func @transform_4(%arg0: i32) -> (i32, i32) {
    %c0_i32 = arith.constant 0 : i32
    %c0_i32_0 = arith.constant 0 : i32
    %c0_i32_1 = arith.constant 0 : i32
    return %c0_i32, %c0_i32_0 : i32, i32
  }
  func.func @transform_5(%arg0: i32) -> (i32, i32) {
    %c0_i32 = arith.constant 0 : i32
    %c0_i32_0 = arith.constant 0 : i32
    %c0_i32_1 = arith.constant 0 : i32
    return %c0_i32, %c0_i32_0 : i32, i32
  }
  func.func @transform_6(%arg0: i32) -> (i32, i32) {
    %c0_i32 = arith.constant 0 : i32
    %c0_i32_0 = arith.constant 0 : i32
    %c0_i32_1 = arith.constant 0 : i32
    return %c0_i32, %c0_i32_0 : i32, i32
  }
  func.func @transform_7(%arg0: i32) -> (i32, i32) {
    %c0_i32 = arith.constant 0 : i32
    %c0_i32_0 = arith.constant 0 : i32
    %c0_i32_1 = arith.constant 0 : i32
    return %c0_i32, %c0_i32_0 : i32, i32
  }
  func.func @transform_8(%arg0: i32) -> (i32, i32) {
    %c0_i32 = arith.constant 0 : i32
    %c0_i32_0 = arith.constant 0 : i32
    %c0_i32_1 = arith.constant 0 : i32
    return %c0_i32, %c0_i32_0 : i32, i32
  }
  func.func @transform_9(%arg0: i32) -> (i32, i32) {
    %c0_i32 = arith.constant 0 : i32
    %c0_i32_0 = arith.constant 0 : i32
    return %arg0, %c0_i32 : i32, i32
  }
}

</mosaic_0001>

<bundles_post_ra>
// kernel: _mlp_q_forward.1
= control target key start
LH: loop header
LB: loop body
LE: loop exit
PB: predicated region body
PF: predicated region fallthrough
CT: control target
= control target key end

     0   :  { %s490_s0 = inlined_call_operand.vmem [shape: f32[2,16], index: 0, kind: input, shape index: {}]   ;;  %s491_s1 = inlined_call_operand.hbm [shape: f32[2,4], index: 1, kind: input, shape index: {}]   ;;  %s492_s2 = inlined_call_operand.hbm [shape: bf16[16,128], index: 2, kind: input, shape index: {}]   ;;  %s493_s3 = inlined_call_operand.vmem [shape: bf16[4,128], index: 3, kind: input, shape index: {}]   ;;  %s494_s4 = inlined_call_operand.vmem [shape: f32[1,128], index: 4, kind: input, shape index: {}]   ;;  %s495_s5 = inlined_call_operand.hbm [shape: bf16[128,128], index: 5, kind: input, shape index: {}]   ;;  %s496_s6 = inlined_call_operand.vmem [shape: f32[1,128], index: 6, kind: input, shape index: {}]   ;;  %s497_s7 = inlined_call_operand.vmem [shape: f32[1,128], index: 7, kind: input, shape index: {}]   ;;  %s498_s8 = inlined_call_operand.<no memory space> [shape: f32[1,1], index: 8, kind: input, shape index: {}]   ;;  %s499_s9 = inlined_call_operand.vmem [shape: f32[16,1], index: 9, kind: output, shape index: {}]  }
   0x1   :  { %v14_v0 = vstv %s498_s8 }
   0x2   :  { %15 = vst [vmem:[#allocation2] sm:$0x1] %v14_v0 }
   0x3   :  { %16 = vsyncpa [#allocation4], 0 }
   0x4   :  { %17 = vsyncpa [#allocation6], 0  ;;  %s37_s13 = sshll.u32 %s492_s2, 4  ;;  %s38_s13 = int_to_ptr.hbm [resolvable:$true] %s37_s13 }
   0x5   :  { %23 = vsyncadd [#allocation4], 224  ;;  %s397_s14 = smov [#allocation5]   ;;  %s24_s18 = sshll.u32 %s491_s1, 4  ;;  %s25_s18 = int_to_ptr.hbm [resolvable:$true] %s24_s18 }
   0x6   :  { %s39_s15 = sshll.u32 %s397_s14, 4  ;;  %s398_s19 = smov 64   ;;  %s40_s15 = int_to_ptr.vmem [resolvable:$true] %s39_s15 }
   0x7   :  { %s399_s20 = smov 4   ;;  %s400_s8 = smov [#allocation3]  }
   0x8   :  { %45 = dma.hbm_to_vmem [thread:$0]  %s38_s13, 128, %s40_s15, [#allocation6], %s398_s19, %s398_s19, %s399_s20  }
   0x9   :  { %s26_s21 = sshll.u32 %s400_s8, 4  ;;  %s401_s22 = smov 32   ;;  %s27_s21 = int_to_ptr.vmem [resolvable:$true] %s26_s21 }
   0xa   :  { %s402_s23 = smov 2   ;;  %s54_s25 = sshll.u32 %s495_s5, 4  ;;  %s55_s25 = int_to_ptr.hbm [resolvable:$true] %s54_s25 }
   0xb   :  { %32 = dma.hbm_to_vmem [thread:$0]  %s25_s18, 32, %s27_s21, [#allocation4], %s401_s22, %s401_s22, %s402_s23  }
   0xc   :  { %s403_s26 = smov [#allocation7]  }
   0xd   :  { %s56_s27 = sshll.u32 %s403_s26, 4  ;;  %s57_s27 = int_to_ptr.vmem [resolvable:$true] %s56_s27 }
   0xe   :  { %62 = dma.hbm_to_vmem [thread:$0]  %s55_s25, 1024, %s57_s27, [#allocation6], %s398_s19, %s398_s19, %s399_s20  }
   0xf   :  { %393 = dma.done.wait [#allocation4], 256  }
  0x10   :  { %394 = vsyncadd [#allocation4], 4294967040 }
  0x11   :  { %395 = dma.done.wait [#allocation6], 1152  }
  0x12   :  { %396 = vsyncadd [#allocation6], 4294966144  ;;  %vm95_vm0 = vcmask 1041408   ;;  %v90_v1 = vld [vmem:[%s493_s3] sm:$0x3]  ;;  %v293_v2 = vld [vmem:[#allocation5] sm:$0xff] }
  0x13   :  { %v85_v3 = vld [vmem:[#allocation3] sm:$0xff]  ;;  %v97_v4 = vsel %vm95_vm0, %v90_v1, 0  ;;  %v86_v5 = vld [vmem:[#allocation3 + $0x8] sm:$0xff]  ;;  %130 = vmatpush.bf16.msra.mxu1 %v293_v2  ;;  %vm91_vm1 = vcmask 31744   ;;  %vm119_vm2 = vcmask 130048   ;;  %v301_v10 = vld [vmem:[#allocation7 + $0x38] sm:$0xff] }
  0x14   :  { %v82_v6 = vld [vmem:[%s490_s0] sm:$0xff]  ;;  %v83_v7 = vld [vmem:[%s490_s0 + $0x8] sm:$0xff]  ;;  %106 = vmatpush.bf16.msra.mxu0 %v97_v4  ;;  %v87_v8 = vpack.c.bf16 %v86_v5, %v85_v3  ;;  %214 = vmatpush.bf16.msra.mxu2 %v301_v10  ;;  %v297_v14 = vld [vmem:[#allocation7 + $0x18] sm:$0xff]  ;;  %vm246_vm3 = vcmask 7168  }
  0x15   :  { %v84_v9 = vpack.c.bf16 %v83_v7, %v82_v6  ;;  %v300_v11 = vld [vmem:[#allocation7 + $0x30] sm:$0xff]  ;;  %v299_v12 = vld [vmem:[#allocation7 + $0x28] sm:$0xff]  ;;  %v298_v13 = vld [vmem:[#allocation7 + $0x20] sm:$0xff] }
  0x16   :  { %v296_v15 = vld [vmem:[#allocation7 + $0x10] sm:$0xff]  ;;  %v295_v16 = vld [vmem:[#allocation7 + $0x8] sm:$0xff]  ;;  %v294_v17 = vld [vmem:[#allocation7] sm:$0xff] }
  0x17   :  { %255 = vmatmul.msk.bf16.vlgmr.msra.gmra.mxu0 %vm91_vm1, %v87_v8  ;;  %260 = vmatmul.msk.bf16.vlgmr.msra.gmra.mxu1 %vm119_vm2, %v84_v9  ;;  %v309_v21 = vld [vmem:[%s494_s4] ss:$0 sm:$0xff] }
  0x18   :  { %215 = vmatpush.bf16.msra.mxu2 %v300_v11  ;;  %v310_v30 = vld [vmem:[%s496_s6] ss:$0 sm:$0xff] }
  0x19   :  { %v311_v33 = vld [vmem:[%s497_s7] ss:$0 sm:$0xff] }
  0x1a   :  { %v312_v40 = vld [vmem:[#allocation2] ss:$0 sm:$0xff] }
  0x1c   :  { %216 = vmatpush.bf16.msra.mxu2 %v299_v12 }
  0x20   :  { %217 = vmatpush.bf16.msra.mxu2 %v298_v13 }
  0x24   :  { %218 = vmatpush.bf16.msra.mxu2 %v297_v14 }
  0x28   :  { %219 = vmatpush.bf16.msra.mxu2 %v296_v15 }
  0x2c   :  { %220 = vmatpush.bf16.msra.mxu2 %v295_v16 }
  0x30   :  { %221 = vmatpush.bf16.msra.mxu2 %v294_v17 }
  0x94   :  { %v108_v18 = vpop.f32.mrf.mxu0  ;;  %v132_v19 = vpop.f32.mrf.mxu1 }
  0x95   :  { %v133_v20 = vadd.f32 %v132_v19, %v108_v18 }
  0x97   :  { %v141_v22 = vadd.f32 %v309_v21, %v133_v20 }
  0x99   :  { %313 = vtanh.f32 %v141_v22 }
  0x9c   :  { %v110_v23 = vpop.f32.mrf.mxu0  ;;  %v134_v24 = vpop.f32.mrf.mxu1 }
  0x9d   :  { %v135_v25 = vadd.f32 %v134_v24, %v110_v23 }
  0x9f   :  { %v142_v26 = vadd.f32 %v309_v21, %v135_v25  ;;  %v314_v27 = vpop.eup %313 }
  0xa1   :  { %315 = vtanh.f32 %v142_v26 }
  0xa7   :  { %v316_v28 = vpop.eup %315 }
  0xa8   :  { %v162_v29 = vpack.c.bf16 %v316_v28, %v314_v27 }
  0xaa   :  { %222 = vmatmul.bf16.vlgmr.msra.gmra.mxu2 %v162_v29 }
 0x12d   :  { %v223_v31 = vpop.f32.mrf.mxu2 }
 0x12e   :  { %v224_v32 = vadd.f32 %v310_v30, %v223_v31 }
 0x130   :  { %317 = vtanh.f32 %v224_v32 }
 0x135   :  { %v225_v34 = vpop.f32.mrf.mxu2 }
 0x136   :  { %v318_v35 = vpop.eup %317  ;;  %v226_v36 = vadd.f32 %v310_v30, %v225_v34 }
 0x137   :  { %v235_v37 = vmul.f32 %v318_v35, %v311_v33 }
 0x138   :  { %319 = vtanh.f32 %v226_v36 }
 0x139   :  { %237 = vadd.xlane.f32.xlu0 %v235_v37 }
 0x13e   :  { %v320_v38 = vpop.eup %319 }
 0x13f   :  { %v236_v39 = vmul.f32 %v320_v38, %v311_v33 }
 0x141   :  { %239 = vadd.xlane.f32.xlu0 %v236_v39 }
 0x1ac   :  { %v238_v41 = vpop.xlane.xlu0 %237 }
 0x1ad   :  { %v244_v42 = vadd.f32 %v312_v40, %v238_v41 }
 0x1af   :  { %247 = vst.msk [vmem:[%s499_s9] sm:$0xff] %vm246_vm3, %v244_v42 }
 0x1b4   :  { %v240_v43 = vpop.xlane.xlu0 %239 }
 0x1b5   :  { %v245_v44 = vadd.f32 %v312_v40, %v240_v43 }
 0x1b7   :  { %248 = vst.msk [vmem:[%s499_s9 + $0x8] sm:$0xff] %vm246_vm3, %v245_v44 }
 0x1b8   :  { %253 = vsyncpa [#allocation4], 1 }
 0x1b9   :  { %254 = vsyncpa [#allocation6], 1 }

</bundles_post_ra>
